<compile_context>
chip_gen: v7x
topology: tpu7x:2x2x1
jax: 0.10.0
libtpu: 0.0.40
codegen_flags: <defaults>
</compile_context>

<pallas_src>
import functools

import jax
import jax.numpy as jnp
from jax.experimental import pallas as pl
from jax.experimental.pallas import tpu as pltpu

LANE = 128

# Mosaic lowers only DEFAULT / HIGHEST matmul precision inside kernels.  The
# in-kernel matmuls are tiny and the step is launch/DMA-bound, so HIGHEST
# (exact f32) is kept for a tight correctness check; switch to DEFAULT for
# maximum MXU throughput at large B/S and loosen the test tolerance.
MXU_PRECISION = jax.lax.Precision.HIGHEST


def _round_up(x, m):
    return (x + m - 1) // m * m


def gru_seq_kernel(proj_ref, state0_ref, w_sg_ref, w_hh_ref, out_ref, state_scr,
                   *, seg: int):
    """One GRU step; grid = (batch_blocks, T), state carried in VMEM scratch."""
    t = pl.program_id(1)

    # (Re)load the initial state into the accumulator at the start of every
    # batch block's time loop.
    @pl.when(t == 0)
    def _():
        state_scr[...] = state0_ref[...]

    state = state_scr[...]          # (BB, SEG) lane-dense recurrent state
    proj = proj_ref[0]              # (BB, 3*SEG) precomputed input projections

    # Gate pre-activations that depend on the recurrent state (one MXU push).
    gate_h = jnp.dot(state, w_sg_ref[...],
                     preferred_element_type=jnp.float32,
                     precision=MXU_PRECISION)            # (BB, 2*SEG)

    # Segments start on 128-lane boundaries -> slices are free.
    update_gate = jax.nn.sigmoid(proj[:, seg:2 * seg] + gate_h[:, :seg])
    reset_gate = jax.nn.sigmoid(proj[:, 2 * seg:3 * seg] + gate_h[:, seg:])

    # Reset-gated h2h matmul: the true serial data dependency.
    state_hat = jnp.tanh(
        proj[:, :seg]
        + jnp.dot(state * reset_gate, w_hh_ref[...],
                  preferred_element_type=jnp.float32,
                  precision=MXU_PRECISION))

    # u*h + (1-u)*s  ==  u*(h - s) + s
    new_state = update_gate * (state_hat - state) + state

    state_scr[...] = new_state
    out_ref[0] = new_state          # lane-dense (BB, SEG) store


def pack_params(params, state_dim, encoder_dim, embed_dim):
    """One-time offline fusion / lane padding of the PyTorch parameters.

    Column layout of the input-side projections (weights and bias), each
    segment starting on a 128-lane boundary:
      seg0 [0, SEG)        input_state pre-activation
      seg1 [SEG, 2*SEG)    update-gate pre-activation
      seg2 [2*SEG, 3*SEG)  reset-gate  pre-activation
    State-side weights are zero-padded to SEG rows/cols so the recurrence is
    128-lane dense; padded lanes stay exactly zero.
    """
    w_os, b_os, w_og, b_og, w_cs, w_cg, w_sg, w_hh = params
    S, E, M = state_dim, encoder_dim, embed_dim
    SEG = _round_up(S, LANE)

    w_out_in = jnp.zeros((M, 3 * SEG), jnp.float32)
    w_out_in = w_out_in.at[:, 0:S].set(w_os)
    w_out_in = w_out_in.at[:, SEG:SEG + S].set(w_og[:, :S])
    w_out_in = w_out_in.at[:, 2 * SEG:2 * SEG + S].set(w_og[:, S:])

    w_ctx_in = jnp.zeros((E, 3 * SEG), jnp.float32)
    w_ctx_in = w_ctx_in.at[:, 0:S].set(w_cs)
    w_ctx_in = w_ctx_in.at[:, SEG:SEG + S].set(w_cg[:, :S])
    w_ctx_in = w_ctx_in.at[:, 2 * SEG:2 * SEG + S].set(w_cg[:, S:])

    b_in = jnp.zeros((1, 3 * SEG), jnp.float32)
    b_in = b_in.at[:, 0:S].set(b_os)
    b_in = b_in.at[:, SEG:SEG + S].set(b_og[:, :S])
    b_in = b_in.at[:, 2 * SEG:2 * SEG + S].set(b_og[:, S:])

    w_sg_pad = jnp.zeros((SEG, 2 * SEG), jnp.float32)
    w_sg_pad = w_sg_pad.at[0:S, 0:S].set(w_sg[:, :S])
    w_sg_pad = w_sg_pad.at[0:S, SEG:SEG + S].set(w_sg[:, S:])

    w_hh_pad = jnp.zeros((SEG, SEG), jnp.float32)
    w_hh_pad = w_hh_pad.at[0:S, 0:S].set(w_hh)

    return w_out_in, w_ctx_in, b_in, w_sg_pad, w_hh_pad


@functools.partial(jax.jit, static_argnames=("batch_block",))
def gru_transition_seq(output_seq, context_seq, state0, packed_params,
                       *, batch_block=None):
    """Run T GRUTransition steps fused into a single pallas_call.

    output_seq:  (T, B, embed_dim)
    context_seq: (T, B, encoder_dim)
    state0:      (B, state_dim)
    Returns the state after every step: (T, B, state_dim).
    """
    w_out_in, w_ctx_in, b_in, w_sg_pad, w_hh_pad = packed_params
    T, B, M = output_seq.shape
    E = context_seq.shape[-1]
    S = state0.shape[-1]
    SEG = w_hh_pad.shape[0]
    N3 = 3 * SEG

    bb = B if batch_block is None else batch_block
    assert B % bb == 0 and (bb == B or bb % 8 == 0)
    nb = B // bb

    # Hoisted, state-independent input projections for the whole sequence:
    # big (T*B, *) matmuls that actually fill MXU rows.  Bias folded in here,
    # so the serial path never re-broadcasts it.
    hi = jax.lax.Precision.HIGH
    proj = (
        jnp.dot(output_seq.reshape(T * B, M), w_out_in, precision=hi)
        + jnp.dot(context_seq.reshape(T * B, E), w_ctx_in, precision=hi)
        + b_in
    ).reshape(T, B, N3)

    # Keep the recurrent state lane-dense (padded to SEG) end to end.
    state0_pad = jnp.pad(state0, ((0, 0), (0, SEG - S)))

    kernel = functools.partial(gru_seq_kernel, seg=SEG)
    cost = pl.CostEstimate(
        flops=T * (2 * B * SEG * 2 * SEG + 2 * B * SEG * SEG + 8 * B * SEG),
        transcendentals=T * 3 * B * SEG,
        bytes_accessed=4 * (T * B * N3 + B * SEG + SEG * 2 * SEG
                            + SEG * SEG + T * B * SEG),
    )
    out = pl.pallas_call(
        kernel,
        out_shape=jax.ShapeDtypeStruct((T, B, SEG), jnp.float32),
        grid=(nb, T),
        in_specs=[
            pl.BlockSpec((1, bb, N3), lambda b, t: (t, b, 0)),    # proj (streamed)
            pl.BlockSpec((bb, SEG), lambda b, t: (b, 0)),         # initial state
            pl.BlockSpec((SEG, 2 * SEG), lambda b, t: (0, 0)),    # w_sg (resident)
            pl.BlockSpec((SEG, SEG), lambda b, t: (0, 0)),        # w_hh (resident)
        ],
        out_specs=pl.BlockSpec((1, bb, SEG), lambda b, t: (t, b, 0)),
        scratch_shapes=[pltpu.VMEM((bb, SEG), jnp.float32)],      # recurrent state
        compiler_params=pltpu.CompilerParams(
            # batch blocks independent (v7x: sharded across both TCs);
            # the time axis is the serial recurrence.
            dimension_semantics=("parallel", "arbitrary"),
            vmem_limit_bytes=32 * 1024 * 1024,
        ),
        cost_estimate=cost,
    )(proj, state0_pad, w_sg_pad, w_hh_pad)

    # Narrow to the caller-visible state width only at the very end.
    return out[:, :, :S]
    # TODO(synk): for production dims, add N-tiling of w_sg/w_hh (BlockSpec over
    # the SEG columns) instead of keeping them fully VMEM-resident.


def gru_transition(output, context, state, packed_params):
    """Single GRUTransition.forward step (exact module semantics)."""
    return gru_transition_seq(output[None], context[None], state, packed_params)[0]


def gru_transition_ref(output, context, state, params):
    """Pure-JAX reference mirroring the PyTorch forward (full f32 matmuls)."""
    w_os, b_os, w_og, b_og, w_cs, w_cg, w_sg, w_hh = params
    hp = jax.lax.Precision.HIGHEST
    dot = lambda a, b: jnp.dot(a, b, precision=hp)
    input_state = dot(output, w_os) + b_os + dot(context, w_cs)
    gate = dot(output, w_og) + b_og + dot(context, w_cg) + dot(state, w_sg)
    S = state.shape[1]
    update_gate = jax.nn.sigmoid(gate[:, :S])
    reset_gate = jax.nn.sigmoid(gate[:, S:])
    state_hat = jnp.tanh(input_state + dot(state * reset_gate, w_hh))
    return update_gate * state_hat + (1.0 - update_gate) * state


def init_params(key, state_dim, encoder_dim, embed_dim):
    """Deterministic synthetic parameters (Linear weights stored as (in, out))."""
    ks = jax.random.split(key, 8)
    u = lambda k, shape, scale: jax.random.uniform(
        k, shape, jnp.float32, -scale, scale
    )
    w_os = u(ks[0], (embed_dim, state_dim), 0.1)
    b_os = u(ks[1], (1, state_dim), 0.1)
    w_og = u(ks[2], (embed_dim, 2 * state_dim), 0.1)
    b_og = u(ks[3], (1, 2 * state_dim), 0.1)
    w_cs = u(ks[4], (encoder_dim, state_dim), 0.1)
    w_cg = u(ks[5], (encoder_dim, 2 * state_dim), 0.1)
    w_sg = u(ks[6], (state_dim, 2 * state_dim), 0.1)
    w_hh = u(ks[7], (state_dim, state_dim), 0.1)
    return (w_os, b_os, w_og, b_og, w_cs, w_cg, w_sg, w_hh)


if __name__ == "__main__":
    state_dim, encoder_dim, embed_dim = 32, 64, 32
    batch, seq_len = 8, 8

    key = jax.random.PRNGKey(0)
    k_out, k_ctx, k_st, k_par = jax.random.split(key, 4)

    output_seq = jax.random.normal(k_out, (seq_len, batch, embed_dim), jnp.float32)
    context_seq = jax.random.normal(k_ctx, (seq_len, batch, encoder_dim), jnp.float32)
    state0 = jax.random.normal(k_st, (batch, state_dim), jnp.float32)
    params = init_params(k_par, state_dim, encoder_dim, embed_dim)

    # One-time offline weight fusion / lane padding.
    packed = pack_params(params, state_dim, encoder_dim, embed_dim)

    # 1) Single step: exactly GRUTransition.forward.
    new_state = gru_transition(output_seq[0], context_seq[0], state0, packed)
    new_state = jax.block_until_ready(new_state)
    ref_state = gru_transition_ref(output_seq[0], context_seq[0], state0, params)
    assert new_state.shape == (batch, state_dim)
    assert jnp.allclose(new_state, ref_state, atol=1e-4, rtol=1e-4)

    # 2) Fused recurrence: T steps in one pallas_call.
    states_seq = gru_transition_seq(output_seq, context_seq, state0, packed)
    states_seq = jax.block_until_ready(states_seq)
    assert states_seq.shape == (seq_len, batch, state_dim)
    ref = state0
    for t in range(seq_len):
        ref = gru_transition_ref(output_seq[t], context_seq[t], ref, params)
        assert jnp.allclose(states_seq[t], ref, atol=1e-4, rtol=1e-4), t

    print("KERNEL_OK")
</pallas_src>

<mosaic_0001>
module attributes {stable_mosaic.version = 11 : i64} {
  func.func @gru_seq_kernel(%arg0: i32, %arg1: i32, %arg2: memref<1x8x384xf32, #tpu.memory_space<vmem>>, %arg3: memref<8x128xf32, #tpu.memory_space<vmem>>, %arg4: memref<128x256xf32, #tpu.memory_space<vmem>>, %arg5: memref<128x128xf32, #tpu.memory_space<vmem>>, %arg6: memref<1x8x128xf32, #tpu.memory_space<vmem>>, %arg7: memref<8x128xf32, #tpu.memory_space<vmem>>) attributes {dimension_semantics = [#tpu.dimension_semantics<parallel>, #tpu.dimension_semantics<arbitrary>], iteration_bounds = array<i64: 1, 1>, scalar_prefetch = 0 : i64, scratch_operands = 1 : i64, tpu.core_type = #tpu.core_type<tc>, window_params = [{transform_indices = @transform_0, window_bounds = array<i64: 1, 8, 384>}, {transform_indices = @transform_1, window_bounds = array<i64: 8, 128>}, {pipeline_mode = #tpu.pipeline_mode<synchronous>, transform_indices = @transform_2, window_bounds = array<i64: 128, 256>}, {pipeline_mode = #tpu.pipeline_mode<synchronous>, transform_indices = @transform_3, window_bounds = array<i64: 128, 128>}, {transform_indices = @transform_4, window_bounds = array<i64: 1, 8, 128>}]} {
    %c0_i32 = arith.constant 0 : i32
    %0 = arith.cmpi eq, %arg1, %c0_i32 : i32
    %1 = arith.extui %0 : i1 to i32
    %c0_i32_0 = arith.constant 0 : i32
    %2 = arith.cmpi ne, %1, %c0_i32_0 : i32
    scf.if %2 {
      %c0_17 = arith.constant 0 : index
      %c0_18 = arith.constant 0 : index
      %37 = vector.load %arg3[%c0_17, %c0_18] : memref<8x128xf32, #tpu.memory_space<vmem>>, vector<8x128xf32>
      %c0_19 = arith.constant 0 : index
      %c0_20 = arith.constant 0 : index
      %38 = vector.load %arg7[%c0_19, %c0_20] : memref<8x128xf32, #tpu.memory_space<vmem>>, vector<8x128xf32>
      tpu.vector_store %arg7[%c0_19, %c0_20], %37 {strides = array<i32>} : memref<8x128xf32, #tpu.memory_space<vmem>>, vector<8x128xf32>,
    } else {
    }
    %c0 = arith.constant 0 : index
    %c0_1 = arith.constant 0 : index
    %3 = vector.load %arg7[%c0, %c0_1] : memref<8x128xf32, #tpu.memory_space<vmem>>, vector<8x128xf32>
    %c0_2 = arith.constant 0 : index
    %c0_3 = arith.constant 0 : index
    %c0_4 = arith.constant 0 : index
    %4 = vector.load %arg2[%c0_2, %c0_3, %c0_4] : memref<1x8x384xf32, #tpu.memory_space<vmem>>, vector<1x8x384xf32>
    %5 = vector.shape_cast %4 : vector<1x8x384xf32> to vector<8x384xf32>
    %c0_5 = arith.constant 0 : index
    %c0_6 = arith.constant 0 : index
    %6 = vector.load %arg4[%c0_5, %c0_6] : memref<128x256xf32, #tpu.memory_space<vmem>>, vector<128x256xf32>
    %cst = arith.constant dense<0.000000e+00> : vector<8x256xf32>
    %7 = tpu.matmul %3, %6, %cst {dimension_numbers = #tpu.dot_dimension_numbers<[1], [0], [0], [1], [0, 0, 1, 1], [], []>, precision = #tpu.contract_precision<fp32>} : vector<8x128xf32>, vector<128x256xf32>, vector<8x256xf32> -> vector<8x256xf32>
    %8 = vector.extract_strided_slice %5 {offsets = [0, 128], sizes = [8, 128], strides = [1, 1]} : vector<8x384xf32> to vector<8x128xf32>
    %9 = vector.extract_strided_slice %7 {offsets = [0, 0], sizes = [8, 128], strides = [1, 1]} : vector<8x256xf32> to vector<8x128xf32>
    %10 = arith.addf %8, %9 : vector<8x128xf32>
    %11 = arith.negf %10 : vector<8x128xf32>
    %12 = math.exp %11 : vector<8x128xf32>
    %cst_7 = arith.constant 1.000000e+00 : f32
    %13 = vector.broadcast %cst_7 : f32 to vector<8x128xf32>
    %14 = arith.addf %13, %12 : vector<8x128xf32>
    %15 = arith.divf %13, %14 : vector<8x128xf32>
    %16 = vector.extract_strided_slice %5 {offsets = [0, 256], sizes = [8, 128], strides = [1, 1]} : vector<8x384xf32> to vector<8x128xf32>
    %17 = vector.extract_strided_slice %7 {offsets = [0, 128], sizes = [8, 128], strides = [1, 1]} : vector<8x256xf32> to vector<8x128xf32>
    %18 = arith.addf %16, %17 : vector<8x128xf32>
    %19 = arith.negf %18 : vector<8x128xf32>
    %20 = math.exp %19 : vector<8x128xf32>
    %cst_8 = arith.constant 1.000000e+00 : f32
    %21 = vector.broadcast %cst_8 : f32 to vector<8x128xf32>
    %22 = arith.addf %21, %20 : vector<8x128xf32>
    %23 = arith.divf %21, %22 : vector<8x128xf32>
    %24 = vector.extract_strided_slice %5 {offsets = [0, 0], sizes = [8, 128], strides = [1, 1]} : vector<8x384xf32> to vector<8x128xf32>
    %25 = arith.mulf %3, %23 : vector<8x128xf32>
    %c0_9 = arith.constant 0 : index
    %c0_10 = arith.constant 0 : index
    %26 = vector.load %arg5[%c0_9, %c0_10] : memref<128x128xf32, #tpu.memory_space<vmem>>, vector<128x128xf32>
    %cst_11 = arith.constant dense<0.000000e+00> : vector<8x128xf32>
    %27 = tpu.matmul %25, %26, %cst_11 {dimension_numbers = #tpu.dot_dimension_numbers<[1], [0], [0], [1], [0, 0, 1, 1], [], []>, precision = #tpu.contract_precision<fp32>} : vector<8x128xf32>, vector<128x128xf32>, vector<8x128xf32> -> vector<8x128xf32>
    %28 = arith.addf %24, %27 : vector<8x128xf32>
    %29 = math.tanh %28 : vector<8x128xf32>
    %30 = arith.subf %29, %3 : vector<8x128xf32>
    %31 = arith.mulf %15, %30 : vector<8x128xf32>
    %32 = arith.addf %31, %3 : vector<8x128xf32>
    %c0_12 = arith.constant 0 : index
    %c0_13 = arith.constant 0 : index
    %33 = vector.load %arg7[%c0_12, %c0_13] : memref<8x128xf32, #tpu.memory_space<vmem>>, vector<8x128xf32>
    tpu.vector_store %arg7[%c0_12, %c0_13], %32 {strides = array<i32>} : memref<8x128xf32, #tpu.memory_space<vmem>>, vector<8x128xf32>,
    %c0_14 = arith.constant 0 : index
    %c0_15 = arith.constant 0 : index
    %c0_16 = arith.constant 0 : index
    %34 = vector.load %arg6[%c0_14, %c0_15, %c0_16] : memref<1x8x128xf32, #tpu.memory_space<vmem>>, vector<1x8x128xf32>
    %35 = vector.shape_cast %34 : vector<1x8x128xf32> to vector<8x128xf32>
    %36 = vector.shape_cast %32 : vector<8x128xf32> to vector<1x8x128xf32>
    tpu.vector_store %arg6[%c0_14, %c0_15, %c0_16], %36 {strides = array<i32>} : memref<1x8x128xf32, #tpu.memory_space<vmem>>, vector<1x8x128xf32>,
    return
  }
  func.func @transform_0(%arg0: i32, %arg1: i32) -> (i32, i32, i32) {
    %c0_i32 = arith.constant 0 : i32
    %c0_i32_0 = arith.constant 0 : i32
    return %arg1, %arg0, %c0_i32 : i32, i32, i32
  }
  func.func @transform_1(%arg0: i32, %arg1: i32) -> (i32, i32) {
    %c0_i32 = arith.constant 0 : i32
    %c0_i32_0 = arith.constant 0 : i32
    return %arg0, %c0_i32 : i32, i32
  }
  func.func @transform_2(%arg0: i32, %arg1: i32) -> (i32, i32) {
    %c0_i32 = arith.constant 0 : i32
    %c0_i32_0 = arith.constant 0 : i32
    %c0_i32_1 = arith.constant 0 : i32
    return %c0_i32, %c0_i32_0 : i32, i32
  }
  func.func @transform_3(%arg0: i32, %arg1: i32) -> (i32, i32) {
    %c0_i32 = arith.constant 0 : i32
    %c0_i32_0 = arith.constant 0 : i32
    %c0_i32_1 = arith.constant 0 : i32
    return %c0_i32, %c0_i32_0 : i32, i32
  }
  func.func @transform_4(%arg0: i32, %arg1: i32) -> (i32, i32, i32) {
    %c0_i32 = arith.constant 0 : i32
    %c0_i32_0 = arith.constant 0 : i32
    return %arg1, %arg0, %c0_i32 : i32, i32, i32
  }
}

</mosaic_0001>

<bundles_post_ra>
// kernel: gru_transition_seq.1
= control target key start
LH: loop header
LB: loop body
LE: loop exit
PB: predicated region body
PF: predicated region fallthrough
CT: control target
= control target key end

     0   :  { %v3198_v9 = vmov 0.0   ;;  %s3191_s0 = inlined_call_operand.vmem [shape: f32[1,8,384], index: 0, kind: input, shape index: {}]   ;;  %s3192_s1 = inlined_call_operand.vmem [shape: f32[8,128], index: 1, kind: input, shape index: {}]   ;;  %s3193_s2 = inlined_call_operand.vmem [shape: f32[128,256], index: 2, kind: input, shape index: {}]   ;;  %s3194_s3 = inlined_call_operand.vmem [shape: f32[128,128], index: 3, kind: input, shape index: {}]   ;;  %s3195_s4 = inlined_call_operand.hbm [shape: f32[1,8,128], index: 4, kind: output, shape index: {}]  }
   0x1   :  { %v29_v0 = vld [vmem:[%s3193_s2 + $0x8] sm:$0xff]  ;;  %v31_v1 = vld [vmem:[%s3193_s2 + $0x18] sm:$0xff]  ;;  %v28_v2 = vld [vmem:[%s3193_s2] sm:$0xff]  ;;  %156 = vmatprep.mubr.f32.mxu0 %v3198_v9 }
   0x2   :  { %v60_v3 = vand.u32 4294901760, %v29_v0  ;;  %v64_v4 = vand.u32 4294901760, %v31_v1  ;;  %v30_v5 = vld [vmem:[%s3193_s2 + $0x10] sm:$0xff]  ;;  %v62_v6 = vand.u32 4294901760, %v28_v2  ;;  %v33_v7 = vld [vmem:[%s3193_s2 + $0x28] sm:$0xff]  ;;  %v35_v8 = vld [vmem:[%s3193_s2 + $0x38] sm:$0xff] }
   0x3   :  { %v66_v10 = vand.u32 4294901760, %v30_v5  ;;  %v68_v11 = vand.u32 4294901760, %v33_v7  ;;  %v72_v12 = vand.u32 4294901760, %v35_v8  ;;  %v32_v13 = vld [vmem:[%s3193_s2 + $0x20] sm:$0xff]  ;;  %v34_v14 = vld [vmem:[%s3193_s2 + $0x30] sm:$0xff]  ;;  %v37_v15 = vld [vmem:[%s3193_s2 + $0x48] sm:$0xff] }
   0x4   :  { %v2364_v16 = vpack.c.bf16 %v64_v4, %v60_v3  ;;  %v39_v17 = vld [vmem:[%s3193_s2 + $0x58] sm:$0xff]  ;;  %v36_v18 = vld [vmem:[%s3193_s2 + $0x40] sm:$0xff]  ;;  %v38_v19 = vld [vmem:[%s3193_s2 + $0x50] sm:$0xff]  ;;  %v70_v23 = vand.u32 4294901760, %v32_v13  ;;  %v74_v24 = vand.u32 4294901760, %v34_v14  ;;  %v76_v25 = vand.u32 4294901760, %v37_v15 }
   0x5   :  { %v2375_v20 = vpack.c.bf16 %v66_v10, %v62_v6  ;;  %v2377_v21 = vpack.c.bf16 %v72_v12, %v68_v11  ;;  %v41_v22 = vld [vmem:[%s3193_s2 + $0x68] sm:$0xff]  ;;  %v80_v26 = vand.u32 4294901760, %v39_v17  ;;  %v78_v27 = vand.u32 4294901760, %v36_v18  ;;  %v43_v29 = vld [vmem:[%s3193_s2 + $0x78] sm:$0xff]  ;;  %v40_v30 = vld [vmem:[%s3193_s2 + $0x60] sm:$0xff] }
   0x6   :  { %3264 = vst [vmem:[#allocation6_spill] sm:$0xff] %v2364_v16  ;;  %1923 = vmatprep.subr.bf16.mxu0 %v2364_v16  ;;  %v82_v28 = vand.u32 4294901760, %v38_v19  ;;  %v2391_v31 = vpack.c.bf16 %v74_v24, %v70_v23  ;;  %v84_v32 = vand.u32 4294901760, %v41_v22  ;;  %v42_v33 = vld [vmem:[%s3193_s2 + $0x70] sm:$0xff]  ;;  %v45_v34 = vld [vmem:[%s3193_s2 + $0x88] sm:$0xff]  ;;  %v47_v35 = vld [vmem:[%s3193_s2 + $0x98] sm:$0xff]  ;;  %v2402_v36 = vsub.f32 %v29_v0, %v60_v3 }
   0x7   :  { %3265 = vst [vmem:[#allocation7_spill] sm:$0xff] %v2375_v20  ;;  %3266 = vst [vmem:[#allocation8_spill] sm:$0xff] %v2377_v21  ;;  %1925 = vmatpush1.bf16.msra.mxu0 %v2375_v20  ;;  %v2404_v37 = vsub.f32 %v31_v1, %v64_v4  ;;  %v2406_v38 = vsub.f32 %v28_v2, %v62_v6  ;;  %v2408_v39 = vpack.c.bf16 %v80_v26, %v76_v25  ;;  %v44_v44 = vld [vmem:[%s3193_s2 + $0x80] sm:$0xff]  ;;  %v46_v49 = vld [vmem:[%s3193_s2 + $0x90] sm:$0xff] }
   0x8   :  { %1927 = vmatprep.subr.bf16.mxu0 %v2377_v21  ;;  %3267 = vst [vmem:[#allocation9_spill] sm:$0xff] %v2391_v31  ;;  %v2410_v40 = vsub.f32 %v30_v5, %v66_v10  ;;  %v2412_v41 = vsub.f32 %v33_v7, %v68_v11  ;;  %v2414_v42 = vpack.c.bf16 %v82_v28, %v78_v27  ;;  %v88_v43 = vand.u32 4294901760, %v43_v29  ;;  %v49_v50 = vld [vmem:[%s3193_s2 + $0xa8] sm:$0xff]  ;;  %v51_v55 = vld [vmem:[%s3193_s2 + $0xb8] sm:$0xff]  ;;  %v48_v56 = vld [vmem:[%s3193_s2 + $0xa0] sm:$0xff] }
   0x9   :  { %3268 = vst [vmem:[#allocation10_spill] sm:$0xff] %v2408_v39  ;;  %v86_v45 = vand.u32 4294901760, %v40_v30  ;;  %v90_v46 = vand.u32 4294901760, %v42_v33  ;;  %v92_v47 = vand.u32 4294901760, %v45_v34  ;;  %v96_v48 = vand.u32 4294901760, %v47_v35 }
   0xa   :  { %3269 = vst [vmem:[#allocation11_spill] sm:$0xff] %v2414_v42  ;;  %v2426_v51 = vsub.f32 %v35_v8, %v72_v12  ;;  %v2428_v52 = vsub.f32 %v32_v13, %v70_v23  ;;  %v2430_v53 = vsub.f32 %v34_v14, %v74_v24  ;;  %v2433_v54 = vpack.c.bf16 %v88_v43, %v84_v32 }
   0xb   :  { %1929 = vmatpush1.bf16.msra.mxu0 %v2391_v31 }
   0xc   :  { %1931 = vmatprep.subr.bf16.mxu0 %v2408_v39  ;;  %3270 = vst [vmem:[#allocation12_spill] sm:$0xff] %v2433_v54 }
   0xd   :  { %9 = vsyncpa [#allocation4], 0  ;;  %v2441_v57 = vsub.f32 %v37_v15, %v76_v25  ;;  %v2443_v58 = vsub.f32 %v39_v17, %v80_v26  ;;  %v2445_v59 = vsub.f32 %v36_v18, %v78_v27  ;;  %v2447_v60 = vsub.f32 %v38_v19, %v82_v28  ;;  %v50_v61 = vld [vmem:[%s3193_s2 + $0xb0] sm:$0xff]  ;;  %v53_v62 = vld [vmem:[%s3193_s2 + $0xc8] sm:$0xff]  ;;  %s2310_s14 = smov [#allocation3]  }
   0xe   :  { %v55_v63 = vld [vmem:[%s3193_s2 + $0xd8] sm:$0xff]  ;;  %v2458_v0 = vsub.f32 %v41_v22, %v84_v32  ;;  %v2460_v1 = vsub.f32 %v43_v29, %v88_v43  ;;  %v94_v2 = vand.u32 4294901760, %v44_v44  ;;  %v98_v3 = vand.u32 4294901760, %v46_v49  ;;  %v52_v8 = vld [vmem:[%s3193_s2 + $0xc0] sm:$0xff]  ;;  %v54_v10 = vld [vmem:[%s3193_s2 + $0xd0] sm:$0xff]  ;;  %s1600_s15 = sshll.u32 %s2310_s14, 4  ;;  %s1601_s15 = int_to_ptr.vmem [resolvable:$true] %s1600_s15 }
   0xf   :  { %1933 = vmatpush1.bf16.msra.mxu0 %v2414_v42  ;;  %v2463_v4 = vpack.c.bf16 %v90_v46, %v86_v45  ;;  %v2465_v5 = vpack.c.bf16 %v96_v48, %v92_v47  ;;  %v100_v6 = vand.u32 4294901760, %v49_v50  ;;  %v104_v7 = vand.u32 4294901760, %v51_v55  ;;  %v2489_v26 = vld [vmem:[%s3192_s1] sm:$0xff]  ;;  %v57_v43 = vld [vmem:[%s3193_s2 + $0xe8] sm:$0xff]  ;;  %p2288_p1 = scmp.lt.s32.totalorder %s1601_s15, %s1601_s15 }
  0x10   :  { %1935 = vmatprep.subr.bf16.mxu0 %v2433_v54  ;;  %v102_v11 = vand.u32 4294901760, %v48_v56  ;;  %v106_v12 = vand.u32 4294901760, %v50_v61  ;;  %v108_v13 = vand.u32 4294901760, %v53_v62  ;;  %v112_v14 = vand.u32 4294901760, %v55_v63  ;;  %3274 = vst [vmem:[#allocation16_spill] sm:$0xff] %v2489_v26 }
  0x11   :  { %3271 = vst [vmem:[#allocation13_spill] sm:$0xff] %v2463_v4  ;;  %3272 = vst [vmem:[#allocation14_spill] sm:$0xff] %v2465_v5  ;;  %v2474_v15 = vsub.f32 %v40_v30, %v86_v45  ;;  %v2476_v17 = vsub.f32 %v42_v33, %v90_v46  ;;  %v2478_v18 = vsub.f32 %v45_v34, %v92_v47  ;;  %v110_v24 = vand.u32 4294901760, %v52_v8  ;;  %v59_v45 = vld [vmem:[%s3193_s2 + $0xf8] sm:$0xff] }
  0x12   :  { %v2480_v19 = vsub.f32 %v47_v35, %v96_v48  ;;  %v2482_v22 = vpack.c.bf16 %v98_v3, %v94_v2  ;;  %v2484_v23 = vsub.f32 %v44_v44, %v94_v2  ;;  %v114_v25 = vand.u32 4294901760, %v54_v10 }
  0x13   :  { %1937 = vmatpush1.bf16.msra.mxu0 %v2463_v4  ;;  %v2492_v27 = vsub.f32 %v46_v49, %v98_v3  ;;  %v2494_v28 = vpack.c.bf16 %v104_v7, %v100_v6  ;;  %v2496_v29 = vsub.f32 %v49_v50, %v100_v6  ;;  %v2498_v30 = vsub.f32 %v51_v55, %v104_v7 }
  0x14   :  { %3273 = vst [vmem:[#allocation15_spill] sm:$0xff] %v2482_v22  ;;  %1939 = vmatprep.subr.bf16.mxu0 %v2465_v5  ;;  %v2501_v32 = vpack.c.bf16 %v106_v12, %v102_v11  ;;  %v2503_v33 = vsub.f32 %v48_v56, %v102_v11  ;;  %v2505_v34 = vsub.f32 %v50_v61, %v106_v12  ;;  %v3197_v46 = vand.u32 4294901760, %v2402_v36  ;;  %v56_v56 = vld [vmem:[%s3193_s2 + $0xe0] sm:$0xff]  ;;  %v2534_v61 = vld [vmem:[%s3193_s2 + $0xf0] sm:$0xff] }
  0x15   :  { %3275 = vst [vmem:[#allocation17_spill] sm:$0xff] %v2494_v28  ;;  %v2507_v35 = vpack.c.bf16 %v112_v14, %v108_v13  ;;  %v2512_v44 = vsub.f32 %v53_v62, %v108_v13  ;;  %v3196_v47 = vand.u32 4294901760, %v2404_v37  ;;  %v2520_v48 = vand.u32 4294901760, %v2489_v26 }
  0x16   :  { %3276 = vst [vmem:[#allocation18_spill] sm:$0xff] %v2501_v32  ;;  %v2522_v49 = vsub.f32 %v55_v63, %v112_v14  ;;  %v2524_v50 = vpack.c.bf16 %v114_v25, %v110_v24  ;;  %v2526_v55 = vsub.f32 %v52_v8, %v110_v24  ;;  %v3200_v62 = vand.u32 4294901760, %v2406_v38 }
  0x17   :  { %3277 = vst [vmem:[#allocation19_spill] sm:$0xff] %v2507_v35  ;;  %1941 = vmatpush1.bf16.msra.mxu0 %v2482_v22  ;;  %v2538_v2 = vsub.f32 %v54_v10, %v114_v25  ;;  %v116_v63 = vand.u32 4294901760, %v57_v43  ;;  %v171_v3 = vsub.f32 %v2402_v36, %v3197_v46  ;;  %v183_v6 = vsub.f32 %v2404_v37, %v3196_v47 }
  0x18   :  { %3278 = vst [vmem:[#allocation20_spill] sm:$0xff] %v2522_v49  ;;  %3279 = vst [vmem:[#allocation21_spill] sm:$0xff] %v2524_v50  ;;  %1943 = vmatprep.subr.bf16.mxu0 %v2494_v28  ;;  %v120_v7 = vand.u32 4294901760, %v59_v45  ;;  %v2549_v8 = vsub.f32 %v2489_v26, %v2520_v48  ;;  %v3202_v11 = vand.u32 4294901760, %v2410_v40  ;;  %v118_v12 = vand.u32 4294901760, %v56_v56 }
  0x19   :  { %3280 = vst [vmem:[#allocation22_spill] sm:$0xff] %v2526_v55  ;;  %3281 = vst [vmem:[#allocation23_spill] sm:$0xff] %v2538_v2  ;;  %v172_v25 = vand.u32 4294901760, %v171_v3  ;;  %v184_v47 = vand.u32 4294901760, %v183_v6  ;;  %v177_v9 = vsub.f32 %v2406_v38, %v3200_v62  ;;  %v3283_v13 = vand.u32 4294901760, %v2412_v41 }
  0x1a   :  { %3282 = vst [vmem:[#allocation24_spill] sm:$0xff] %v2549_v8  ;;  %v189_v10 = vsub.f32 %v2410_v40, %v3202_v11  ;;  %v3284_v24 = vand.u32 4294901760, %v2426_v51  ;;  %v3215_v6 = vand.u32 4294901760, %v2430_v53  ;;  %v2572_v46 = vpack.c.bf16 %v120_v7, %v116_v63 }
  0x1b   :  { %1945 = vmatpush1.bf16.msra.mxu0 %v2501_v32  ;;  %v195_v14 = vsub.f32 %v2412_v41, %v3283_v13  ;;  %v2574_v62 = vsub.f32 %v57_v43, %v116_v63  ;;  %v2576_v26 = vsub.f32 %v59_v45, %v120_v7  ;;  %v3286_v32 = vand.u32 4294901760, %v2534_v61 }
  0x1c   :  { %v207_v3 = vsub.f32 %v2426_v51, %v3284_v24  ;;  %1947 = vmatprep.subr.bf16.mxu0 %v2507_v35  ;;  %3285 = vst [vmem:[#allocation25_spill] sm:$0xff] %v2572_v46  ;;  %v3288_v13 = vand.u32 4294901760, %v2428_v52  ;;  %v213_v35 = vsub.f32 %v2430_v53, %v3215_v6  ;;  %v3220_v22 = vand.u32 4294901760, %v2443_v58 }
  0x1d   :  { %v2581_v28 = vpack.c.bf16 %v3286_v32, %v118_v12  ;;  %v1954_v43 = vpack.c.bf16 %v184_v47, %v172_v25  ;;  %v3289_v45 = vand.u32 4294901760, %v2549_v8  ;;  %v178_v7 = vand.u32 4294901760, %v177_v9 }
  0x1e   :  { %v201_v24 = vsub.f32 %v2428_v52, %v3288_v13  ;;  %v190_v32 = vand.u32 4294901760, %v189_v10  ;;  %v196_v5 = vand.u32 4294901760, %v195_v14  ;;  %v208_v4 = vand.u32 4294901760, %v207_v3 }
  0x1f   :  { %3287 = vst [vmem:[#allocation26_spill] sm:$0xff] %v2581_v28  ;;  %v160_v63 = vsub.f32 %v2549_v8, %v3289_v45  ;;  %1949 = vmatpush1.bf16.msra.mxu0 %v2524_v50  ;;  %v3223_v13 = vand.u32 4294901760, %v2447_v60  ;;  %v3290_v6 = vand.u32 4294901760, %v2441_v57  ;;  %v231_v25 = vsub.f32 %v2443_v58, %v3220_v22 }
  0x20   :  { %1951 = vmatprep.subr.bf16.mxu0 %v2572_v46  ;;  %v3228_v9 = vand.u32 4294901760, %v2458_v0  ;;  %v3233_v45 = vand.u32 4294901760, %v2460_v1  ;;  %v202_v11 = vand.u32 4294901760, %v201_v24  ;;  %v214_v10 = vand.u32 4294901760, %v213_v35 }
  0x21   :  { %v219_v47 = vsub.f32 %v2441_v57, %v3290_v6  ;;  %v3291_v14 = vand.u32 4294901760, %v2445_v59  ;;  %v237_v46 = vsub.f32 %v2447_v60, %v3223_v13  ;;  %v161_v50 = vand.u32 4294901760, %v160_v63 }
  0x22   :  { %v243_v6 = vsub.f32 %v2458_v0, %v3228_v9  ;;  %v255_v22 = vsub.f32 %v2460_v1, %v3233_v45  ;;  %v2619_v35 = vsub.f32 %v56_v56, %v118_v12  ;;  %v3244_v54 = vand.u32 4294901760, %v2476_v17 }
  0x23   :  { %v225_v3 = vsub.f32 %v2445_v59, %v3291_v14  ;;  %1953 = vmatpush1.bf16.msra.mxu0 %v2581_v28  ;;  %v1956_v14 = vpack.c.bf16 %v190_v32, %v178_v7  ;;  %v3238_v13 = vand.u32 4294901760, %v2478_v18  ;;  %v1958_v63 = vpack.c.bf16 %v208_v4, %v196_v5 }
  0x24   :  { %1955 = vmatprep.subr.bf16.mxu0 %v1954_v43  ;;  %v220_v42 = vand.u32 4294901760, %v219_v47  ;;  %v232_v39 = vand.u32 4294901760, %v231_v25  ;;  %v3237_v9 = vand.u32 4294901760, %v2480_v19  ;;  %v1960_v31 = vpack.c.bf16 %v214_v10, %v202_v11 }
  0x25   :  { %v226_v21 = vand.u32 4294901760, %v225_v3  ;;  %v238_v45 = vand.u32 4294901760, %v237_v46  ;;  %v3236_v24 = vand.u32 4294901760, %v2484_v23  ;;  %v244_v28 = vand.u32 4294901760, %v243_v6 }
  0x26   :  { %162 = vmatmul.mubr.f32.vlgmr.msra.gmra.mrb[0].mxu0 %v161_v50  ;;  %v256_v56 = vand.u32 4294901760, %v255_v22  ;;  %v3292_v12 = vand.u32 4294901760, %v2474_v15  ;;  %v3239_v32 = vand.u32 4294901760, %v2492_v27  ;;  %v261_v4 = vsub.f32 %v2476_v17, %v3244_v54 }
  0x27   :  { %1957 = vmatpush1.bf16.msra.mxu0 %v1956_v14  ;;  %v267_v5 = vsub.f32 %v2478_v18, %v3238_v13  ;;  %v279_v46 = vsub.f32 %v2480_v19, %v3237_v9  ;;  %v3293_v22 = vmov 0.0   ;;  %v1962_v50 = vpack.c.bf16 %v232_v39, %v220_v42 }
  0x28   :  { %v249_v7 = vsub.f32 %v2474_v15, %v3292_v12  ;;  %392 = vmatprep.mubr.f32.mxu0 %v3293_v22  ;;  %1959 = vmatprep.subr.bf16.mxu0 %v1958_v63  ;;  %v273_v11 = vsub.f32 %v2484_v23, %v3236_v24  ;;  %v3243_v43 = vand.u32 4294901760, %v2496_v29  ;;  %v3242_v47 = vand.u32 4294901760, %v2498_v30 }
  0x29   :  { %v3294_v25 = vand.u32 4294901760, %v2534_v61  ;;  %v285_v3 = vsub.f32 %v2492_v27, %v3239_v32  ;;  %v3240_v6 = vand.u32 4294901760, %v2503_v33  ;;  %v3241_v39 = vand.u32 4294901760, %v2505_v34 }
  0x2a   :  { %v1964_v42 = vpack.c.bf16 %v238_v45, %v226_v21  ;;  %v1966_v14 = vpack.c.bf16 %v256_v56, %v244_v28  ;;  %v250_v63 = vand.u32 4294901760, %v249_v7  ;;  %v3247_v12 = vand.u32 4294901760, %v2512_v44 }
  0x2b   :  { %v2647_v10 = vsub.f32 %v2534_v61, %v3294_v25  ;;  %1961 = vmatpush1.bf16.msra.mxu0 %v1960_v31  ;;  %v262_v24 = vand.u32 4294901760, %v261_v4  ;;  %v268_v9 = vand.u32 4294901760, %v267_v5  ;;  %v280_v13 = vand.u32 4294901760, %v279_v46 }
  0x2c   :  { %v326_v61 = vand.u32 4294901760, %v2522_v49  ;;  %1963 = vmatprep.subr.bf16.mxu0 %v1962_v50  ;;  %v274_v25 = vand.u32 4294901760, %v273_v11  ;;  %v291_v32 = vsub.f32 %v2496_v29, %v3243_v43  ;;  %v303_v21 = vsub.f32 %v2498_v30, %v3242_v47 }
  0x2d   :  { %v320_v28 = vand.u32 4294901760, %v2526_v55  ;;  %v286_v45 = vand.u32 4294901760, %v285_v3  ;;  %v297_v31 = vsub.f32 %v2503_v33, %v3240_v6  ;;  %v309_v56 = vsub.f32 %v2505_v34, %v3241_v39 }
  0x2e   :  { %v332_v7 = vand.u32 4294901760, %v2538_v2  ;;  %v315_v4 = vsub.f32 %v2512_v44, %v3247_v12  ;;  %v327_v5 = vsub.f32 %v2522_v49, %v326_v61  ;;  %v338_v46 = vand.u32 4294901760, %v2574_v62 }
  0x2f   :  { %v350_v50 = vand.u32 4294901760, %v2576_v26  ;;  %1965 = vmatpush1.bf16.msra.mxu0 %v1964_v42  ;;  %v1968_v11 = vpack.c.bf16 %v262_v24, %v250_v63  ;;  %v321_v3 = vsub.f32 %v2526_v55, %v320_v28  ;;  %v344_v39 = vand.u32 4294901760, %v2619_v35 }
  0x30   :  { %v333_v6 = vsub.f32 %v2538_v2, %v332_v7  ;;  %1967 = vmatprep.subr.bf16.mxu0 %v1966_v14  ;;  %v1970_v47 = vpack.c.bf16 %v280_v13, %v268_v9  ;;  %v292_v43 = vand.u32 4294901760, %v291_v32  ;;  %v304_v54 = vand.u32 4294901760, %v303_v21 }
  0x31   :  { %v1972_v20 = vpack.c.bf16 %v286_v45, %v274_v25  ;;  %v298_v12 = vand.u32 4294901760, %v297_v31  ;;  %v310_v8 = vand.u32 4294901760, %v309_v56  ;;  %v316_v16 = vand.u32 4294901760, %v315_v4 }
  0x32   :  { %v328_v49 = vand.u32 4294901760, %v327_v5  ;;  %v339_v22 = vsub.f32 %v2574_v62, %v338_v46  ;;  %v351_v42 = vsub.f32 %v2576_v26, %v350_v50  ;;  %v322_v24 = vand.u32 4294901760, %v321_v3 }
  0x33   :  { %1969 = vmatpush1.bf16.msra.mxu0 %v1968_v11  ;;  %v334_v63 = vand.u32 4294901760, %v333_v6  ;;  %v345_v2 = vsub.f32 %v2619_v35, %v344_v39  ;;  %v356_v55 = vand.u32 4294901760, %v2647_v10  ;;  %v1974_v13 = vpack.c.bf16 %v304_v54, %v292_v43 }
  0x34   :  { %1971 = vmatprep.subr.bf16.mxu0 %v1970_v47  ;;  %v1976_v9 = vpack.c.bf16 %v310_v8, %v298_v12  ;;  %v1978_v32 = vpack.c.bf16 %v328_v49, %v316_v16  ;;  %v340_v14 = vand.u32 4294901760, %v339_v22  ;;  %v352_v25 = vand.u32 4294901760, %v351_v42 }
  0x35   :  { %v1980_v21 = vpack.c.bf16 %v334_v63, %v322_v24  ;;  %v346_v45 = vand.u32 4294901760, %v345_v2  ;;  %v357_v31 = vsub.f32 %v2647_v10, %v356_v55  ;;  %v3295_v56 = vand.u32 4294901760, %v2402_v36 }
  0x36   :  { %v3296_v4 = vand.u32 4294901760, %v2404_v37  ;;  %v3297_v5 = vand.u32 4294901760, %v2406_v38  ;;  %v3298_v54 = vand.u32 4294901760, %v2410_v40  ;;  %v3299_v16 = vand.u32 4294901760, %v2412_v41 }
  0x37   :  { %1973 = vmatpush1.bf16.msra.mxu0 %v1972_v20  ;;  %v3300_v20 = vand.u32 4294901760, %v2426_v51  ;;  %v3301_v2 = vand.u32 4294901760, %v2428_v52  ;;  %v3302_v22 = vand.u32 4294901760, %v2430_v53  ;;  %v3303_v47 = vand.u32 4294901760, %v2441_v57 }
  0x38   :  { %v2688_v6 = vpack.c.bf16 %v3296_v4, %v3295_v56  ;;  %1975 = vmatprep.subr.bf16.mxu0 %v1974_v13  ;;  %v2694_v8 = vpack.c.bf16 %v3298_v54, %v3297_v5  ;;  %v3304_v12 = vand.u32 4294901760, %v2443_v58  ;;  %v3305_v3 = vand.u32 4294901760, %v2445_v59 }
  0x39   :  { %v2700_v49 = vpack.c.bf16 %v3300_v20, %v3299_v16  ;;  %v2706_v43 = vpack.c.bf16 %v3302_v22, %v3301_v2  ;;  %v3306_v42 = vand.u32 4294901760, %v2447_v60  ;;  %v3307_v63 = vand.u32 4294901760, %v2458_v0 }
  0x3a   :  { %v2712_v11 = vpack.c.bf16 %v3304_v12, %v3303_v47  ;;  %v3308_v13 = vand.u32 4294901760, %v2460_v1  ;;  %v3309_v4 = vand.u32 4294901760, %v2474_v15  ;;  %v3310_v5 = vand.u32 4294901760, %v2476_v17 }
  0x3b   :  { %v2718_v24 = vpack.c.bf16 %v3306_v42, %v3305_v3  ;;  %v3311_v16 = vand.u32 4294901760, %v2478_v18  ;;  %v3312_v20 = vand.u32 4294901760, %v2480_v19  ;;  %v3314_v22 = vand.u32 4294901760, %v2484_v23  ;;  %1977 = vmatpush1.bf16.msra.mxu0 %v1976_v9 }
  0x3c   :  { %v2724_v56 = vpack.c.bf16 %v3308_v13, %v3307_v63  ;;  %v2730_v54 = vpack.c.bf16 %v3310_v5, %v3309_v4  ;;  %v3315_v47 = vand.u32 4294901760, %v2492_v27  ;;  %v3317_v3 = vand.u32 4294901760, %v2496_v29  ;;  %1979 = vmatprep.subr.bf16.mxu0 %v1978_v32 }
  0x3d   :  { %v2736_v2 = vpack.c.bf16 %v3312_v20, %v3311_v16  ;;  %v3318_v42 = vand.u32 4294901760, %v2498_v30  ;;  %v3319_v13 = vand.u32 4294901760, %v2503_v33  ;;  %v3320_v4 = vand.u32 4294901760, %v2505_v34 }
  0x3e   :  { %v2742_v12 = vpack.c.bf16 %v3315_v47, %v3314_v22  ;;  %v3321_v16 = vand.u32 4294901760, %v2512_v44  ;;  %v2760_v22 = vpack.c.bf16 %v332_v7, %v320_v28  ;;  %v2762_v47 = vpack.c.bf16 %v350_v50, %v338_v46  ;;  %v3340_v7 = vld [vmem:[#allocation21_spill] sm:$0xff]  ;;  %v3342_v50 = vld [vmem:[#allocation26_spill] sm:$0xff] }
  0x3f   :  { %3313 = vst [vmem:[#allocation27_spill] sm:$0xff] %v2736_v2  ;;  %v2748_v63 = vpack.c.bf16 %v3318_v42, %v3317_v3  ;;  %v2754_v5 = vpack.c.bf16 %v3320_v4, %v3319_v13  ;;  %v358_v2 = vand.u32 4294901760, %v357_v31  ;;  %v1982_v3 = vpack.c.bf16 %v352_v25, %v340_v14  ;;  %1981 = vmatpush1.bf16.msra.mxu0 %v1980_v21  ;;  %v3341_v46 = vld [vmem:[#allocation25_spill] sm:$0xff]  ;;  %v931_v21 = vld [vmem:[%s3194_s3 + $0x8] sm:$0xff]  ;;  %v936_v4 = vld [vmem:[%s3194_s3 + $0x30] sm:$0xff] }
  0x40   :  { %3316 = vst [vmem:[#allocation28_spill] sm:$0xff] %v2742_v12  ;;  %v2758_v20 = vpack.c.bf16 %v326_v61, %v3321_v16  ;;  %v2764_v12 = vpack.c.bf16 %v356_v55, %v344_v39  ;;  %v1986_v13 = vpack.c.bf16 %v2404_v37, %v2402_v36  ;;  %v1988_v61 = vpack.c.bf16 %v2410_v40, %v2406_v38  ;;  %v930_v25 = vld [vmem:[%s3194_s3] sm:$0xff] }
  0x41   :  { %v1984_v42 = vpack.c.bf16 %v358_v2, %v346_v45  ;;  %1983 = vmatprep.subr.bf16.mxu0 %v1982_v3  ;;  %v1990_v28 = vpack.c.bf16 %v2426_v51, %v2412_v41  ;;  %v1992_v55 = vpack.c.bf16 %v2430_v53, %v2428_v52  ;;  %v3322_v39 = vmov 0.0  }
  0x42   :  { %v1994_v36 = vpack.c.bf16 %v2443_v58, %v2441_v57  ;;  %v1996_v37 = vpack.c.bf16 %v2447_v60, %v2445_v59  ;;  %v1998_v38 = vpack.c.bf16 %v2460_v1, %v2458_v0  ;;  %v2000_v40 = vpack.c.bf16 %v2476_v17, %v2474_v15  ;;  %v3323_v57 = vld [vmem:[#allocation20_spill] sm:$0xff]  ;;  %v3324_v59 = vld [vmem:[#allocation22_spill] sm:$0xff]  ;;  %v3325_v60 = vld [vmem:[#allocation23_spill] sm:$0xff] }
  0x43   :  { %1985 = vmatpush1.bf16.msra.mxu0 %v1984_v42  ;;  %v2002_v41 = vpack.c.bf16 %v2480_v19, %v2478_v18  ;;  %v2004_v51 = vpack.c.bf16 %v2492_v27, %v2484_v23  ;;  %v2006_v52 = vpack.c.bf16 %v2498_v30, %v2496_v29  ;;  %v2008_v53 = vpack.c.bf16 %v2505_v34, %v2503_v33  ;;  %v3326_v17 = vld [vmem:[#allocation6_spill] sm:$0xff]  ;;  %v3327_v18 = vld [vmem:[#allocation24_spill] sm:$0xff]  ;;  %v3328_v19 = vld [vmem:[#allocation7_spill] sm:$0xff] }
  0x44   :  { %1987 = vmatprep.subr.bf16.mxu0 %v1986_v13  ;;  %v2010_v58 = vpack.c.bf16 %v3323_v57, %v2512_v44  ;;  %v2012_v0 = vpack.c.bf16 %v3325_v60, %v3324_v59  ;;  %v2014_v1 = vpack.c.bf16 %v2576_v26, %v2574_v62  ;;  %v2016_v15 = vpack.c.bf16 %v2647_v10, %v2619_v35  ;;  %v3329_v23 = vld [vmem:[#allocation8_spill] sm:$0xff]  ;;  %v3330_v27 = vld [vmem:[#allocation9_spill] sm:$0xff]  ;;  %v3331_v29 = vld [vmem:[#allocation10_spill] sm:$0xff] }
  0x45   :  { %v3332_v26 = vld [vmem:[#allocation11_spill] sm:$0xff]  ;;  %v3333_v30 = vld [vmem:[#allocation12_spill] sm:$0xff]  ;;  %v3334_v33 = vld [vmem:[#allocation13_spill] sm:$0xff]  ;;  %v3343_v9 = vand.u32 4294901760, %v3327_v18  ;;  %v947_v45 = vand.u32 4294901760, %v930_v25  ;;  %v950_v31 = vand.u32 4294901760, %v931_v21 }
  0x46   :  { %394 = vmatmul.mubr.f32.vlgmr.msra.gmra.mrb[0].mxu0 %v2520_v48  ;;  %v3335_v34 = vld [vmem:[#allocation14_spill] sm:$0xff]  ;;  %v3336_v44 = vld [vmem:[#allocation15_spill] sm:$0xff]  ;;  %v3337_v62 = vld [vmem:[#allocation17_spill] sm:$0xff]  ;;  %v965_v16 = vand.u32 4294901760, %v936_v4  ;;  %vm2309_vm0 = vmmov 0  }
  0x47   :  { %1989 = vmatpush1.bf16.msra.mxu0 %v1988_v61  ;;  %528 = vmatprep.mubr.f32.mxu0 %v3322_v39  ;;  %v3338_v35 = vld [vmem:[#allocation18_spill] sm:$0xff]  ;;  %v3339_v10 = vld [vmem:[#allocation19_spill] sm:$0xff]  ;;  %v3345_v14 = vld [vmem:[#allocation28_spill] sm:$0xff] }
  0x48   :  { %1991 = vmatprep.subr.bf16.mxu0 %v1990_v28  ;;  %v3344_v32 = vld [vmem:[#allocation27_spill] sm:$0xff]  ;;  %v938_v13 = vld [vmem:[%s3194_s3 + $0x40] sm:$0xff]  ;;  %v939_v61 = vld [vmem:[%s3194_s3 + $0x48] sm:$0xff]  ;;  %1744 = vmatprep.mubr.msk.f32.mxu1 %vm2309_vm0, %v3322_v39 }
  0x49   :  { %v940_v28 = vld [vmem:[%s3194_s3 + $0x50] sm:$0xff]  ;;  %v974_v57 = vand.u32 4294901760, %v939_v61 }
  0x4a   :  { %v944_v59 = vld [vmem:[%s3194_s3 + $0x70] sm:$0xff] }
  0x4b   :  { %1993 = vmatpush1.bf16.msra.mxu0 %v1992_v55 }
  0x4c   :  { %1995 = vmatprep.subr.bf16.mxu0 %v1994_v36 }
  0x4f   :  { %1997 = vmatpush1.bf16.msra.mxu0 %v1996_v37 }
  0x50   :  { %1999 = vmatprep.subr.bf16.mxu0 %v1998_v38  ;;  %v2916_v38 = vsub.f32 %v936_v4, %v965_v16 }
  0x53   :  { %2001 = vmatpush1.bf16.msra.mxu0 %v2000_v40  ;;  %v941_v40 = vld [vmem:[%s3194_s3 + $0x58] sm:$0xff] }
  0x54   :  { %2003 = vmatprep.subr.bf16.mxu0 %v2002_v41  ;;  %v942_v41 = vld [vmem:[%s3194_s3 + $0x60] sm:$0xff]  ;;  %v980_v60 = vand.u32 4294901760, %v941_v40 }
  0x57   :  { %2005 = vmatpush1.bf16.msra.mxu0 %v2004_v51  ;;  %v943_v51 = vld [vmem:[%s3194_s3 + $0x68] sm:$0xff] }
  0x58   :  { %2007 = vmatprep.subr.bf16.mxu0 %v2006_v52 }
  0x5b   :  { %2009 = vmatpush1.bf16.msra.mxu0 %v2008_v53  ;;  %v971_v53 = vand.u32 4294901760, %v938_v13 }
  0x5c   :  { %2011 = vmatprep.subr.bf16.mxu0 %v2010_v58  ;;  %v977_v58 = vand.u32 4294901760, %v940_v28 }
  0x5f   :  { %2013 = vmatpush1.bf16.msra.mxu0 %v2012_v0  ;;  %v983_v0 = vand.u32 4294901760, %v942_v41 }
  0x60   :  { %2015 = vmatprep.subr.bf16.mxu0 %v2014_v1  ;;  %v986_v1 = vand.u32 4294901760, %v943_v51 }
  0x63   :  { %2017 = vmatpush1.bf16.msra.mxu0 %v2016_v15  ;;  %v945_v15 = vld [vmem:[%s3194_s3 + $0x78] sm:$0xff] }
  0x64   :  { %2019 = vmatprep.subr.bf16.mxu0 %v3326_v17 }
  0x66   :  { %531 = vmatmul.mubr.f32.vlgmr.msra.gmra.mrb[0].mxu0 %v3327_v18  ;;  %v2937_v18 = vpack.c.bf16 %v974_v57, %v971_v53 }
  0x67   :  { %2021 = vmatpush1.bf16.msra.mxu0 %v3328_v19  ;;  %633 = vmatprep.mubr.f32.mxu0 %v3322_v39 }
  0x68   :  { %2023 = vmatprep.subr.bf16.mxu0 %v3329_v23 }
  0x6b   :  { %2025 = vmatpush1.bf16.msra.mxu0 %v3330_v27 }
  0x6c   :  { %2027 = vmatprep.subr.bf16.mxu0 %v3331_v29 }
  0x6f   :  { %2029 = vmatpush1.bf16.msra.mxu0 %v3332_v26 }
  0x70   :  { %2031 = vmatprep.subr.bf16.mxu0 %v3333_v30 }
  0x73   :  { %2033 = vmatpush1.bf16.msra.mxu0 %v3334_v33 }
  0x74   :  { %2035 = vmatprep.subr.bf16.mxu0 %v3335_v34 }
  0x77   :  { %2037 = vmatpush1.bf16.msra.mxu0 %v3336_v44 }
  0x78   :  { %2039 = vmatprep.subr.bf16.mxu0 %v3337_v62 }
  0x7b   :  { %2041 = vmatpush1.bf16.msra.mxu0 %v3338_v35 }
  0x7c   :  { %2043 = vmatprep.subr.bf16.mxu0 %v3339_v10 }
  0x7f   :  { %2045 = vmatpush1.bf16.msra.mxu0 %v3340_v7 }
  0x80   :  { %2047 = vmatprep.subr.bf16.mxu0 %v3341_v46 }
  0x83   :  { %2049 = vmatpush1.bf16.msra.mxu0 %v3342_v50 }
  0x84   :  { %2051 = vmatprep.subr.bf16.mxu0 %v2688_v6  ;;  %v2862_v6 = vpack.c.bf16 %v950_v31, %v947_v45 }
  0x86   :  { %637 = vmatmul.mubr.f32.vlgmr.msra.gmra.mrb[0].mxu0 %v3343_v9 }
  0x87   :  { %2053 = vmatpush1.bf16.msra.mxu0 %v2694_v8  ;;  %803 = vmatprep.mubr.f32.mxu0 %v3322_v39  ;;  %v2308_v8 = vmov 0.0|0.0  }
  0x88   :  { %2055 = vmatprep.subr.bf16.mxu0 %v2700_v49  ;;  %2114 = vmatprep.subr.bf16.mxu1 %v2308_v8  ;;  %v932_v49 = vld [vmem:[%s3194_s3 + $0x10] sm:$0xff] }
  0x89   :  { %2116 = vmatpush3.bf16.msra.mxu1 %v2862_v6 }
  0x8a   :  { %2117 = vmatprep.subr.bf16.mxu1 %v2308_v8 }
  0x8b   :  { %2057 = vmatpush1.bf16.msra.mxu0 %v2706_v43  ;;  %v953_v43 = vand.u32 4294901760, %v932_v49 }
  0x8c   :  { %2059 = vmatprep.subr.bf16.mxu0 %v2712_v11 }
  0x8d   :  { %v2896_v3 = vsub.f32 %v932_v49, %v953_v43 }
  0x8f   :  { %2061 = vmatpush1.bf16.msra.mxu0 %v2718_v24 }
  0x90   :  { %2063 = vmatprep.subr.bf16.mxu0 %v2724_v56  ;;  %v934_v56 = vld [vmem:[%s3194_s3 + $0x20] sm:$0xff] }
  0x91   :  { %v959_v2 = vand.u32 4294901760, %v934_v56 }
  0x93   :  { %2065 = vmatpush1.bf16.msra.mxu0 %v2730_v54  ;;  %v935_v54 = vld [vmem:[%s3194_s3 + $0x28] sm:$0xff]  ;;  %v2910_v55 = vsub.f32 %v934_v56, %v959_v2 }
  0x94   :  { %2067 = vmatprep.subr.bf16.mxu0 %v3344_v32 }
  0x97   :  { %2069 = vmatpush1.bf16.msra.mxu0 %v3345_v14 }
  0x98   :  { %2071 = vmatprep.subr.bf16.mxu0 %v2748_v63 }
  0x9b   :  { %2073 = vmatpush1.bf16.msra.mxu0 %v2754_v5  ;;  %v937_v5 = vld [vmem:[%s3194_s3 + $0x38] sm:$0xff] }
  0x9c   :  { %2075 = vmatprep.subr.bf16.mxu0 %v2758_v20  ;;  %v968_v20 = vand.u32 4294901760, %v937_v5 }
  0x9e   :  { %v2914_v37 = vpack.c.bf16 %v968_v20, %v965_v16  ;;  %v2927_v52 = vsub.f32 %v937_v5, %v968_v20  ;;  %v1082_v16 = vand.u32 4294901760, %v2916_v38 }
  0x9f   :  { %2077 = vmatpush1.bf16.msra.mxu0 %v2760_v22  ;;  %v2892_v22 = vsub.f32 %v930_v25, %v947_v45  ;;  %v1054_v25 = vand.u32 4294901760, %v2896_v3 }
  0xa0   :  { %2079 = vmatprep.subr.bf16.mxu0 %v2762_v47  ;;  %v2894_v47 = vsub.f32 %v931_v21, %v950_v31  ;;  %v3263_v20 = vand.u32 4294901760, %v2927_v52 }
  0xa1   :  { %v1055_v31 = vsub.f32 %v2896_v3, %v1054_v25 }
  0xa3   :  { %2081 = vmatpush1.bf16.msra.mxu0 %v2764_v12  ;;  %v962_v12 = vand.u32 4294901760, %v935_v54 }
  0xa4   :  { %2083 = vmatprep.subr.bf16.mxu0 %v3326_v17  ;;  %v989_v17 = vand.u32 4294901760, %v944_v59 }
  0xa5   :  { %v2883_v63 = vpack.c.bf16 %v962_v12, %v959_v2  ;;  %v2912_v36 = vsub.f32 %v935_v54, %v962_v12 }
  0xa6   :  { %805 = vmatmul.mubr.f32.vlgmr.msra.gmra.mrb[0].mxu0 %v2520_v48 }
  0xa7   :  { %2085 = vmatpush1.bf16.msra.mxu0 %v3328_v19  ;;  %907 = vmatprep.mubr.f32.mxu0 %v3322_v39  ;;  %v2939_v19 = vsub.f32 %v938_v13, %v971_v53  ;;  %v1075_v56 = vand.u32 4294901760, %v2912_v36 }
  0xa8   :  { %2087 = vmatprep.subr.bf16.mxu0 %v3329_v23  ;;  %v2941_v23 = vsub.f32 %v939_v61, %v974_v57  ;;  %v1083_v61 = vsub.f32 %v2916_v38, %v1082_v16 }
  0xa9   :  { %v1076_v12 = vsub.f32 %v2912_v36, %v1075_v56 }
  0xaa   :  { %v3261_v53 = vand.u32 4294901760, %v2941_v23 }
  0xab   :  { %2089 = vmatpush1.bf16.msra.mxu0 %v3330_v27  ;;  %v2943_v27 = vsub.f32 %v940_v28, %v977_v58  ;;  %v1077_v5 = vand.u32 4294901760, %v1076_v12  ;;  %v1090_v28 = vsub.f32 %v2927_v52, %v3263_v20 }
  0xac   :  { %2091 = vmatprep.subr.bf16.mxu0 %v3331_v29  ;;  %v2945_v29 = vsub.f32 %v941_v40, %v980_v60  ;;  %v1084_v40 = vand.u32 4294901760, %v1083_v61 }
  0xaf   :  { %2093 = vmatpush1.bf16.msra.mxu0 %v3332_v26  ;;  %v2947_v26 = vsub.f32 %v942_v41, %v983_v0  ;;  %v1091_v41 = vand.u32 4294901760, %v1090_v28 }
  0xb0   :  { %2095 = vmatprep.subr.bf16.mxu0 %v3333_v30  ;;  %v2949_v30 = vsub.f32 %v943_v51, %v986_v1  ;;  %v3262_v51 = vand.u32 4294901760, %v2939_v19 }
  0xb1   :  { %v2148_v57 = vpack.c.bf16 %v1091_v41, %v1084_v40 }
  0xb3   :  { %2097 = vmatpush1.bf16.msra.mxu0 %v3334_v33  ;;  %v992_v33 = vand.u32 4294901760, %v945_v15 }
  0xb4   :  { %2099 = vmatprep.subr.bf16.mxu0 %v3335_v34  ;;  %v2951_v34 = vsub.f32 %v944_v59, %v989_v17  ;;  %v1104_v59 = vsub.f32 %v2941_v23, %v3261_v53 }
  0xb7   :  { %2101 = vmatpush1.bf16.msra.mxu0 %v3336_v44  ;;  %v2954_v44 = vpack.c.bf16 %v980_v60, %v977_v58  ;;  %v1097_v58 = vsub.f32 %v2939_v19, %v3262_v51 }
  0xb8   :  { %2103 = vmatprep.subr.bf16.mxu0 %v3337_v62  ;;  %v2959_v62 = vsub.f32 %v945_v15, %v992_v33  ;;  %v3259_v15 = vand.u32 4294901760, %v2945_v29 }
  0xb9   :  { %v1098_v60 = vand.u32 4294901760, %v1097_v58 }
  0xbb   :  { %2105 = vmatpush1.bf16.msra.mxu0 %v3338_v35  ;;  %v2962_v35 = vpack.c.bf16 %v986_v1, %v983_v0  ;;  %v1105_v0 = vand.u32 4294901760, %v1104_v59  ;;  %v3260_v1 = vand.u32 4294901760, %v2943_v27 }
  0xbc   :  { %2107 = vmatprep.subr.bf16.mxu0 %v3339_v10  ;;  %v2966_v10 = vpack.c.bf16 %v992_v33, %v989_v17 }
  0xbd   :  { %v2151_v17 = vpack.c.bf16 %v1105_v0, %v1098_v60  ;;  %v1111_v33 = vsub.f32 %v2943_v27, %v3260_v1  ;;  %v2163_v60 = vpack.c.bf16 %v2894_v47, %v2892_v22 }
  0xbf   :  { %2109 = vmatpush1.bf16.msra.mxu0 %v3340_v7  ;;  %v1040_v7 = vand.u32 4294901760, %v2892_v22 }
  0xc0   :  { %2111 = vmatprep.subr.bf16.mxu0 %v3341_v46  ;;  %v1047_v46 = vand.u32 4294901760, %v2894_v47 }
  0xc2   :  { %v1048_v9 = vsub.f32 %v2894_v47, %v1047_v46  ;;  %v3347_v47 = vand.u32 4294901760, %v2927_v52 }
  0xc3   :  { %2113 = vmatpush1.bf16.msra.mxu0 %v3342_v50  ;;  %v1041_v50 = vsub.f32 %v2892_v22, %v1040_v7 }
  0xc4   :  { %v1049_v14 = vand.u32 4294901760, %v1048_v9  ;;  %v1112_v9 = vand.u32 4294901760, %v1111_v33  ;;  %v2169_v33 = vpack.c.bf16 %v2912_v36, %v2910_v55  ;;  %v3351_v36 = vand.u32 4294901760, %v2945_v29 }
  0xc5   :  { %v1042_v32 = vand.u32 4294901760, %v1041_v50  ;;  %v1118_v50 = vsub.f32 %v2945_v29, %v3259_v15 }
  0xc6   :  { %909 = vmatmul.mubr.f32.vlgmr.msra.gmra.mrb[0].mxu0 %v2520_v48  ;;  %v933_v48 = vld [vmem:[%s3194_s3 + $0x18] sm:$0xff] }
  0xc7   :  { %v956_v11 = vand.u32 4294901760, %v933_v48  ;;  %v2981_v45 = vpack.c.bf16 %v1049_v14, %v1042_v32  ;;  %v1119_v32 = vand.u32 4294901760, %v1118_v50  ;;  %v3258_v14 = vand.u32 4294901760, %v2947_v26 }
  0xc8   :  { %v2172_v50 = vpack.c.bf16 %v2927_v52, %v2916_v38  ;;  %v3352_v38 = vand.u32 4294901760, %v2947_v26  ;;  %v3353_v52 = vand.u32 4294901760, %v2949_v30 }
  0xc9   :  { %v2873_v24 = vpack.c.bf16 %v956_v11, %v953_v43  ;;  %v2898_v42 = vsub.f32 %v933_v48, %v956_v11  ;;  %v1056_v48 = vand.u32 4294901760, %v1055_v31  ;;  %v1068_v11 = vand.u32 4294901760, %v2910_v55 }
  0xca   :  { %v3257_v31 = vand.u32 4294901760, %v2949_v30 }
  0xcb   :  { %2119 = vmatpush3.bf16.msra.mxu1 %v2873_v24  ;;  %v1061_v21 = vand.u32 4294901760, %v2898_v42  ;;  %v1069_v2 = vsub.f32 %v2910_v55, %v1068_v11  ;;  %v2166_v0 = vpack.c.bf16 %v2898_v42, %v2896_v3  ;;  %v2217_v22 = vpack.c.bf16 %v1075_v56, %v1068_v11 }
  0xcc   :  { %2120 = vmatprep.subr.bf16.mxu1 %v2308_v8  ;;  %v2220_v3 = vpack.c.bf16 %v3347_v47, %v1082_v16  ;;  %v3350_v55 = vand.u32 4294901760, %v2943_v27 }
  0xcd   :  { %v1062_v49 = vsub.f32 %v2898_v42, %v1061_v21  ;;  %v1070_v4 = vand.u32 4294901760, %v1069_v2  ;;  %v3348_v42 = vand.u32 4294901760, %v2939_v19 }
  0xcf   :  { %2122 = vmatpush3.bf16.msra.mxu1 %v2883_v63  ;;  %v1063_v43 = vand.u32 4294901760, %v1062_v49  ;;  %v3001_v13 = vpack.c.bf16 %v1077_v5, %v1070_v4  ;;  %v2154_v49 = vpack.c.bf16 %v1119_v32, %v1112_v9  ;;  %v3256_v4 = vand.u32 4294901760, %v2951_v34 }
  0xd0   :  { %2123 = vmatprep.subr.bf16.mxu1 %v2308_v8  ;;  %v3255_v5 = vand.u32 4294901760, %v2959_v62  ;;  %v2175_v9 = vpack.c.bf16 %v2941_v23, %v2939_v19  ;;  %v2178_v32 = vpack.c.bf16 %v2945_v29, %v2943_v27  ;;  %v3354_v19 = vand.u32 4294901760, %v2951_v34 }
  0xd1   :  { %v2991_v54 = vpack.c.bf16 %v1063_v43, %v1056_v48  ;;  %v1125_v48 = vsub.f32 %v2947_v26, %v3258_v14  ;;  %v1132_v43 = vsub.f32 %v2949_v30, %v3257_v31  ;;  %v1139_v28 = vsub.f32 %v2951_v34, %v3256_v4  ;;  %v3346_v31 = vld [vmem:[#allocation16_spill] sm:$0xff] }
  0xd2   :  { %v1146_v40 = vsub.f32 %v2959_v62, %v3255_v5 }
  0xd3   :  { %2125 = vmatpush3.bf16.msra.mxu1 %v2914_v37  ;;  %v1126_v2 = vand.u32 4294901760, %v1125_v48  ;;  %v1133_v12 = vand.u32 4294901760, %v1132_v43  ;;  %v1140_v41 = vand.u32 4294901760, %v1139_v28  ;;  %v2181_v48 = vpack.c.bf16 %v2949_v30, %v2947_v26 }
  0xd4   :  { %2126 = vmatprep.subr.bf16.mxu1 %v2308_v8  ;;  %v1147_v58 = vand.u32 4294901760, %v1146_v40  ;;  %v2184_v43 = vpack.c.bf16 %v2959_v62, %v2951_v34 }
  0xd5   :  { %v2157_v61 = vpack.c.bf16 %v1133_v12, %v1126_v2  ;;  %v27_v2 = vld [vmem:[%s3191_s0 + $0x10] sm:$0xff] }
  0xd6   :  { %v2160_v59 = vpack.c.bf16 %v1147_v58, %v1140_v41 }
  0xd7   :  { %2128 = vmatpush3.bf16.msra.mxu1 %v2937_v18 }
  0xd8   :  { %2129 = vmatprep.subr.bf16.mxu1 %v2308_v8 }
  0xdb   :  { %2131 = vmatpush3.bf16.msra.mxu1 %v2954_v44 }
  0xdc   :  { %2132 = vmatprep.subr.bf16.mxu1 %v2308_v8 }
  0xdf   :  { %2134 = vmatpush3.bf16.msra.mxu1 %v2962_v35 }
  0xe0   :  { %2135 = vmatprep.subr.bf16.mxu1 %v2308_v8 }
  0xe3   :  { %2137 = vmatpush3.bf16.msra.mxu1 %v2966_v10 }
  0xe4   :  { %2138 = vmatprep.subr.bf16.mxu1 %v2308_v8 }
 0x199   :  { %v3060_v12 = vpop.f32.mrb[0].mxu0 }
 0x19a   :  { %v912_v28 = vpop.f32.mrb[1].mxu0 }
 0x19b   :  { %v922_v40 = vadd.f32 %v912_v28, %v27_v2 }
 0x19d   :  { %v1609_v41 = vmul.f32 -1.442695, %v922_v40 }
 0x19f   :  { %2272 = vpow2.f32 %v1609_v41 }
 0x1a9   :  { %v2273_v58 = vpop.eup %2272 }
 0x1aa   :  { %v926_v5 = vadd.f32 1.0, %v2273_v58 }
 0x1ac   :  { %2274 = vrcp.f32 %v926_v5 }
 0x1b6   :  { %v2275_v4 = vpop.eup %2274 }
 0x1b7   :  { %v929_v14 = vmul.f32 %v2275_v4, %v3346_v31 }
 0x1b9   :  { %v3063_v15 = vand.u32 4294901760, %v929_v14 }
 0x1bb   :  { %v1028_v1 = vsub.f32 %v929_v14, %v3063_v15 }
 0x1bd   :  { %v1029_v53 = vand.u32 4294901760, %v1028_v1 }
 0x1bf   :  { %v1030_v51 = vsub.f32 %v1028_v1, %v1029_v53 }
 0x1c1   :  { %v1031_v20 = vand.u32 4294901760, %v1030_v51 }
 0x1c3   :  { %1745 = vmatmul.mubr.f32.vlgmr.msra.gmra.mrb[0].mxu1 %v1031_v20  ;;  %v25_v20 = vld [vmem:[%s3191_s0] sm:$0xff] }
 0x1c4   :  { %2140 = vmatpush3.bf16.msra.mxu1 %v2981_v45  ;;  %1779 = vmatprep.mubr.msk.f32.mxu1 %vm2309_vm0, %v3322_v39  ;;  %v2211_v45 = vpack.c.bf16 %v1047_v46, %v1040_v7  ;;  %v3349_v7 = vand.u32 4294901760, %v2941_v23  ;;  %v3355_v23 = vand.u32 4294901760, %v2959_v62 }
 0x1c5   :  { %2141 = vmatprep.subr.bf16.mxu1 %v2308_v8 }
 0x1c6   :  { %v2223_v46 = vpack.c.bf16 %v3349_v7, %v3348_v42  ;;  %v2232_v11 = vpack.c.bf16 %v3355_v23, %v3354_v19 }
 0x1c8   :  { %2143 = vmatpush3.bf16.msra.mxu1 %v2991_v54  ;;  %v2214_v54 = vpack.c.bf16 %v1061_v21, %v1054_v25  ;;  %v2226_v25 = vpack.c.bf16 %v3351_v36, %v3350_v55  ;;  %v2229_v21 = vpack.c.bf16 %v3353_v52, %v3352_v38 }
 0x1c9   :  { %2144 = vmatprep.subr.bf16.mxu1 %v2308_v8 }
 0x1cc   :  { %2146 = vmatpush3.bf16.msra.mxu1 %v3001_v13 }
 0x1cd   :  { %2147 = vmatprep.subr.bf16.mxu1 %v2308_v8 }
 0x1d0   :  { %2149 = vmatpush3.bf16.msra.mxu1 %v2148_v57 }
 0x1d1   :  { %2150 = vmatprep.subr.bf16.mxu1 %v2308_v8 }
 0x1d4   :  { %2152 = vmatpush3.bf16.msra.mxu1 %v2151_v17  ;;  %v2282_v17 = vld [vmem:[%s3192_s1] sm:$0xff] }
 0x1d5   :  { %2153 = vmatprep.subr.bf16.mxu1 %v2308_v8 }
 0x1d8   :  { %2155 = vmatpush3.bf16.msra.mxu1 %v2154_v49 }
 0x1d9   :  { %2156 = vmatprep.subr.bf16.mxu1 %v2308_v8 }
 0x1dc   :  { %2158 = vmatpush3.bf16.msra.mxu1 %v2157_v61 }
 0x1dd   :  { %2159 = vmatprep.subr.bf16.mxu1 %v2308_v8 }
 0x1e0   :  { %2161 = vmatpush3.bf16.msra.mxu1 %v2160_v59 }
 0x1e1   :  { %2162 = vmatprep.subr.bf16.mxu1 %v2308_v8 }
 0x1e3   :  { %1780 = vmatmul.mubr.f32.vlgmr.msra.gmra.mrb[2].mxu1 %v3063_v15 }
 0x1e4   :  { %2164 = vmatpush3.bf16.msra.mxu1 %v2163_v60  ;;  %1814 = vmatprep.mubr.msk.f32.mxu1 %vm2309_vm0, %v3322_v39 }
 0x1e5   :  { %2165 = vmatprep.subr.bf16.mxu1 %v2308_v8 }
 0x1e8   :  { %2167 = vmatpush3.bf16.msra.mxu1 %v2166_v0 }
 0x1e9   :  { %2168 = vmatprep.subr.bf16.mxu1 %v2308_v8 }
 0x1ec   :  { %2170 = vmatpush3.bf16.msra.mxu1 %v2169_v33 }
 0x1ed   :  { %2171 = vmatprep.subr.bf16.mxu1 %v2308_v8 }
 0x1f0   :  { %2173 = vmatpush3.bf16.msra.mxu1 %v2172_v50 }
 0x1f1   :  { %2174 = vmatprep.subr.bf16.mxu1 %v2308_v8 }
 0x1f4   :  { %2176 = vmatpush3.bf16.msra.mxu1 %v2175_v9 }
 0x1f5   :  { %2177 = vmatprep.subr.bf16.mxu1 %v2308_v8 }
 0x1f8   :  { %2179 = vmatpush3.bf16.msra.mxu1 %v2178_v32 }
 0x1f9   :  { %2180 = vmatprep.subr.bf16.mxu1 %v2308_v8 }
 0x1fc   :  { %2182 = vmatpush3.bf16.msra.mxu1 %v2181_v48 }
 0x1fd   :  { %2183 = vmatprep.subr.bf16.mxu1 %v2308_v8 }
 0x200   :  { %2185 = vmatpush3.bf16.msra.mxu1 %v2184_v43 }
 0x201   :  { %2186 = vmatprep.subr.bf16.mxu1 %v2308_v8 }
 0x203   :  { %1815 = vmatmul.mubr.f32.vlgmr.msra.gmra.mrb[4].mxu1 %v1028_v1 }
 0x204   :  { %2188 = vmatpush3.bf16.msra.mxu1 %v2862_v6  ;;  %1849 = vmatprep.mubr.msk.f32.mxu1 %vm2309_vm0, %v3322_v39 }
 0x205   :  { %2189 = vmatprep.subr.bf16.mxu1 %v2308_v8 }
 0x208   :  { %2191 = vmatpush3.bf16.msra.mxu1 %v2873_v24 }
 0x209   :  { %2192 = vmatprep.subr.bf16.mxu1 %v2308_v8 }
 0x20c   :  { %2194 = vmatpush3.bf16.msra.mxu1 %v2883_v63 }
 0x20d   :  { %2195 = vmatprep.subr.bf16.mxu1 %v2308_v8 }
 0x210   :  { %2197 = vmatpush3.bf16.msra.mxu1 %v2914_v37 }
 0x211   :  { %2198 = vmatprep.subr.bf16.mxu1 %v2308_v8 }
 0x214   :  { %2200 = vmatpush3.bf16.msra.mxu1 %v2937_v18 }
 0x215   :  { %2201 = vmatprep.subr.bf16.mxu1 %v2308_v8 }
 0x218   :  { %2203 = vmatpush3.bf16.msra.mxu1 %v2954_v44 }
 0x219   :  { %2204 = vmatprep.subr.bf16.mxu1 %v2308_v8 }
 0x21c   :  { %2206 = vmatpush3.bf16.msra.mxu1 %v2962_v35 }
 0x21d   :  { %2207 = vmatprep.subr.bf16.mxu1 %v2308_v8 }
 0x220   :  { %2209 = vmatpush3.bf16.msra.mxu1 %v2966_v10 }
 0x221   :  { %2210 = vmatprep.subr.bf16.mxu1 %v2308_v8 }
 0x223   :  { %1850 = vmatmul.mubr.f32.vlgmr.msra.gmra.mrb[6].mxu1 %v1029_v53 }
 0x224   :  { %2212 = vmatpush3.bf16.msra.mxu1 %v2211_v45  ;;  %1884 = vmatprep.mubr.msk.f32.mxu1 %vm2309_vm0, %v3322_v39 }
 0x225   :  { %2213 = vmatprep.subr.bf16.mxu1 %v2308_v8 }
 0x228   :  { %2215 = vmatpush3.bf16.msra.mxu1 %v2214_v54 }
 0x229   :  { %2216 = vmatprep.subr.bf16.mxu1 %v2308_v8 }
 0x22c   :  { %2218 = vmatpush3.bf16.msra.mxu1 %v2217_v22 }
 0x22d   :  { %2219 = vmatprep.subr.bf16.mxu1 %v2308_v8 }
 0x230   :  { %2221 = vmatpush3.bf16.msra.mxu1 %v2220_v3 }
 0x231   :  { %2222 = vmatprep.subr.bf16.mxu1 %v2308_v8 }
 0x234   :  { %2224 = vmatpush3.bf16.msra.mxu1 %v2223_v46 }
 0x235   :  { %2225 = vmatprep.subr.bf16.mxu1 %v2308_v8 }
 0x238   :  { %2227 = vmatpush3.bf16.msra.mxu1 %v2226_v25 }
 0x239   :  { %2228 = vmatprep.subr.bf16.mxu1 %v2308_v8 }
 0x23c   :  { %2230 = vmatpush3.bf16.msra.mxu1 %v2229_v21 }
 0x23d   :  { %2231 = vmatprep.subr.bf16.mxu1 %v2308_v8 }
 0x240   :  { %2233 = vmatpush3.bf16.msra.mxu1 %v2232_v11 }
 0x241   :  { %2234 = vmatprep.subr.bf16.mxu1 %v2308_v8 }
 0x243   :  { %1885 = vmatmul.mubr.f32.vlgmr.msra.gmra.mrb[8].mxu1 %v3063_v15 }
 0x244   :  { %2236 = vmatpush3.bf16.msra.mxu1 %v2862_v6  ;;  %1919 = vmatprep.mubr.msk.f32.mxu1 %vm2309_vm0, %v3322_v39 }
 0x245   :  { %2237 = vmatprep.subr.bf16.mxu1 %v2308_v8 }
 0x248   :  { %2239 = vmatpush3.bf16.msra.mxu1 %v2873_v24 }
 0x249   :  { %2240 = vmatprep.subr.bf16.mxu1 %v2308_v8 }
 0x24c   :  { %2242 = vmatpush3.bf16.msra.mxu1 %v2883_v63 }
 0x24d   :  { %2243 = vmatprep.subr.bf16.mxu1 %v2308_v8 }
 0x250   :  { %2245 = vmatpush3.bf16.msra.mxu1 %v2914_v37 }
 0x251   :  { %2246 = vmatprep.subr.bf16.mxu1 %v2308_v8 }
 0x254   :  { %2248 = vmatpush3.bf16.msra.mxu1 %v2937_v18 }
 0x255   :  { %2249 = vmatprep.subr.bf16.mxu1 %v2308_v8 }
 0x258   :  { %2251 = vmatpush3.bf16.msra.mxu1 %v2954_v44 }
 0x259   :  { %2252 = vmatprep.subr.bf16.mxu1 %v2308_v8 }
 0x25c   :  { %2254 = vmatpush3.bf16.msra.mxu1 %v2962_v35 }
 0x25d   :  { %2255 = vmatprep.subr.bf16.mxu1 %v2308_v8  ;;  %v26_v8 = vld [vmem:[%s3191_s0 + $0x8] sm:$0xff]  ;;  %s2283_s0 = scalar_lea.vmem %s1601_s15, 128 }
 0x25e   :  { %p2284_p0 = scmp.ne.s32.totalorder %s1601_s15, %s2283_s0  ;;  %p2289_p2 = scmp.lt.s32.totalorder %s2283_s0, %s2283_s0 }
 0x260   :  { %2257 = vmatpush3.bf16.msra.mxu1 %v2966_v10  ;;  %v915_v10 = vadd.f32 %v3060_v12, %v26_v8  ;;  %p2290_p3 = por %p2289_p2, %p2288_p1 }
 0x262   :  { %v1608_v56 = vmul.f32 -1.442695, %v915_v10  ;;  %p2291_p4 = pnand %p2290_p3, %p2284_p0 }
 0x263   :  { %1920 = vmatmul.mubr.f32.vlgmr.msra.gmra.mrb[10].mxu1 %v3063_v15 }
 0x264   :  { %2276 = vpow2.f32 %v1608_v56 }
 0x26e   :  { %v2277_v16 = vpop.eup %2276 }
 0x26f   :  { %v919_v57 = vadd.f32 1.0, %v2277_v16 }
 0x296   :  { %v1033_v39 = vpop.f32.mrb[0].mxu1 }
 0x297   :  { %v1746_v6 = vpop.f32.mrb[1].mxu1 }
 0x2b6   :  { %v1184_v24 = vpop.f32.mrb[2].mxu1 }
 0x2b7   :  { %v1185_v63 = vadd.f32 %v1184_v24, %v1033_v39  ;;  %v1781_v37 = vpop.f32.mrb[3].mxu1 }
 0x2d6   :  { %v1288_v18 = vpop.f32.mrb[4].mxu1 }
 0x2d7   :  { %v1289_v27 = vadd.f32 %v1288_v18, %v1185_v63  ;;  %v1816_v29 = vpop.f32.mrb[5].mxu1 }
 0x2f6   :  { %v1377_v26 = vpop.f32.mrb[6].mxu1 }
 0x2f7   :  { %v1378_v30 = vadd.f32 %v1377_v26, %v1289_v27  ;;  %v1851_v34 = vpop.f32.mrb[7].mxu1 }
 0x316   :  { %v1496_v44 = vpop.f32.mrb[8].mxu1 }
 0x317   :  { %v1497_v62 = vadd.f32 %v1496_v44, %v1378_v30  ;;  %v1886_v35 = vpop.f32.mrb[9].mxu1 }
 0x336   :  { %v1583_v13 = vpop.f32.mrb[10].mxu1 }
 0x337   :  { %v1584_v51 = vadd.f32 %v1583_v13, %v1497_v62  ;;  %v1921_v53 = vpop.f32.mrb[11].mxu1 }
 0x339   :  { %v1587_v1 = vadd.f32 %v1584_v51, %v25_v20 }
 0x33b   :  { %2278 = vtanh.f32 %v1587_v1 }
 0x33c   :  { %2280 = vrcp.f32 %v919_v57 }
 0x345   :  { %v2279_v15 = vpop.eup %2278 }
 0x346   :  { %v1589_v14 = vsub.f32 %v2279_v15, %v2282_v17  ;;  %v2281_v31 = vpop.eup %2280 }
 0x348   :  { %v1590_v49 = vmul.f32 %v2281_v31, %v1589_v14 }
 0x34a   :  { %v1591_v4 = vadd.f32 %v2282_v17, %v1590_v49 }
 0x34c   :  { %1593 = vst [vmem:[#allocation3] sm:$0xff] %v1591_v4 }
 0x34d   :  { %2294 = shalt.err (!%p2291_p4)
}
 0x34e   :  { %s2295_s18 = scalar_lea.hbm %s3195_s4, 128 }
 0x34f   :  { %p2296_p5 = scmp.ne.s32.totalorder %s3195_s4, %s2295_s18  ;;  %p2299_p6 = scmp.lt.u32.totalorder %s2295_s18, %s3195_s4 }
 0x351   :  { %p2301_p7 = pnand %p2299_p6, %p2296_p5 }
 0x353   :  { %2304 = shalt.err (!%p2301_p7)
}
 0x354   :  { %1603 = dma.vmem_to_hbm [thread:$0]  %s1601_s15, 128, %s3195_s4, [#allocation4]  }
 0x355   :  { %2305 = dma.done.wait [#allocation4], 128  }
 0x356   :  { %2306 = vsyncadd [#allocation4], 4294967168 }
 0x357   :  { %1607 = vsyncpa [#allocation4], 1 }

</bundles_post_ra>
